<compile_context>
chip_gen: v6e
topology: v6e:2x2x1
jax: 0.10.0
libtpu: 0.0.40
codegen_flags: <defaults>
</compile_context>

<pallas_src>
import functools

import jax
import jax.numpy as jnp
from jax import lax
from jax.experimental import pallas as pl
from jax.experimental.pallas import tpu as pltpu


def _round_up(x, m):
    return ((x + m - 1) // m) * m


def _l2norm_kernel(eps2, x_ref, o_ref):
    """Row-wise L2 normalization (block of rows)."""
    x = x_ref[...].astype(jnp.float32)
    sq = jnp.sum(x * x, axis=-1, keepdims=True)
    o_ref[...] = (x * lax.rsqrt(jnp.maximum(sq, jnp.float32(eps2)))).astype(o_ref.dtype)


def _d2dce_kernel(n_real, tm, inv_temp, bias, m_p,
                  en_ref, proxy_ref, labc_ref, labr_ref, out_ref):
    """Rows [i*tm, i*tm+tm) of the similarity matrix -> per-row criterion."""
    i = pl.program_id(0)
    eps = jnp.float32(1e-8)

    row_start = pl.multiple_of(i * tm, tm)
    en_all = en_ref[...]                                        # (N_pad, D) resident
    e_blk = en_ref[pl.ds(row_start, tm), :]                     # (tm, D)

    # Pairwise cosine-similarity block: A · Bᵀ directly on the MXU
    # (inputs are pre-normalized rows).
    sim = lax.dot_general(
        e_blk, en_all,
        dimension_numbers=(((1,), (1,)), ((), ())),
        preferred_element_type=jnp.float32)                     # (tm, N_pad)
    sim = sim * jnp.float32(inv_temp) + jnp.float32(bias)

    n_pad = en_all.shape[0]
    r_glb = row_start + lax.broadcasted_iota(jnp.int32, (tm, 1), 0)   # global row ids
    c_idx = lax.broadcasted_iota(jnp.int32, (1, n_pad), 1)            # column ids
    col_ok = c_idx < n_real
    not_diag = r_glb != c_idx

    # Row-wise max over real, off-diagonal entries.
    neg_big = jnp.float32(-3.0e38)
    sim_max = jnp.max(jnp.where(not_diag & col_ok, sim, neg_big),
                      axis=1, keepdims=True)                    # (tm, 1)
    t = jnp.maximum(sim, 0.0) - sim_max                         # relu(sim) - max

    # removal_fn: keep entries whose labels differ (diag auto-removed since
    # label[r] == label[r]); also drop padded columns.  Fused with exp().
    keep = col_ok & (labc_ref[...] != labr_ref[...])
    row_sum = jnp.sum(jnp.where(keep, jnp.exp(t), 0.0),
                      axis=1, keepdims=True)                    # (tm, 1)

    # Sample-to-proxy cosine similarity for this row block.
    p = proxy_ref[...].astype(jnp.float32)                      # (tm, D)
    psq = jnp.sum(p * p, axis=-1, keepdims=True)
    p_n = p * lax.rsqrt(jnp.maximum(psq, eps * eps))
    smp2proxy = jnp.sum(e_blk.astype(jnp.float32) * p_n,
                        axis=-1, keepdims=True)                 # (tm, 1)

    pos_attr = jnp.maximum((jnp.float32(m_p) - smp2proxy) * jnp.float32(inv_temp), 0.0)
    neg_repul = jnp.log(jnp.exp(-pos_attr) + row_sum)
    crit = pos_attr + neg_repul                                 # (tm, 1)

    row_ok = r_glb < n_real                                     # zero padded rows
    out_ref[...] = jnp.where(row_ok, crit, 0.0)


def data2data_cross_entropy_loss(embed, proxy, label, num_classes=10,
                                 temperature=0.5, m_p=0.98,
                                 use_bf16_matmul=False, row_block=None):
    """Pallas TPU implementation of Data2DataCrossEntropyLoss.forward."""
    del num_classes  # labels are class ids; only label equality matters
    n, d = embed.shape
    eps = 1e-8

    # Row-tile selection: multiple of 8, sized so the live (tm, N) slabs plus
    # the resident normalized embedding fit comfortably in scoped VMEM.
    if row_block is not None:
        tm = _round_up(int(row_block), 8)
    else:
        tm = min(256, _round_up(n, 8))
        while tm > 8:
            n_pad_try = _round_up(n, tm)
            est = 4 * (2 * n_pad_try * d + 6 * tm * n_pad_try + 2 * tm * d)
            if est <= (36 << 20):
                break
            tm = max(8, _round_up(tm // 2, 8))
    n_pad = _round_up(n, tm)
    nb = n_pad // tm

    pad = n_pad - n
    if pad:
        embed = jnp.pad(embed, ((0, pad), (0, 0)))
        proxy = jnp.pad(proxy, ((0, pad), (0, 0)))
        label = jnp.pad(label, ((0, pad),))
    lab = label.astype(jnp.int32)
    lab_col = lab.reshape(n_pad, 1)
    lab_row = lab.reshape(1, n_pad)

    en_dtype = jnp.bfloat16 if use_bf16_matmul else jnp.float32

    # Stage 1: L2-normalize the embedding once (tiny, fully parallel kernel).
    e_n = pl.pallas_call(
        functools.partial(_l2norm_kernel, eps * eps),
        out_shape=jax.ShapeDtypeStruct((n_pad, d), en_dtype),
        grid=(nb,),
        in_specs=[pl.BlockSpec((tm, d), lambda i: (i, 0))],
        out_specs=pl.BlockSpec((tm, d), lambda i: (i, 0)),
        compiler_params=pltpu.CompilerParams(
            dimension_semantics=("parallel",)),
    )(embed)

    inv_temp = 1.0 / float(temperature)
    bias = (float(m_p) - 1.0) * inv_temp
    kernel = functools.partial(_d2dce_kernel, n, tm, inv_temp, bias, float(m_p))

    en_bytes = 2 if use_bf16_matmul else 4
    est_vmem = (2 * n_pad * d * en_bytes + 4 * 6 * tm * n_pad
                + 4 * 4 * tm * d) + (1 << 20)
    vmem_limit = int(min(max(est_vmem, 32 << 20), 48 << 20))

    # Stage 2: per-row-block similarity slab + per-row criterion.
    crit = pl.pallas_call(
        kernel,
        out_shape=jax.ShapeDtypeStruct((n_pad, 1), jnp.float32),
        grid=(nb,),
        in_specs=[
            pl.BlockSpec((n_pad, d), lambda i: (0, 0)),   # normalized embed, resident
            pl.BlockSpec((tm, d), lambda i: (i, 0)),      # proxy row block
            pl.BlockSpec((tm, 1), lambda i: (i, 0)),      # labels of the block rows
            pl.BlockSpec((1, n_pad), lambda i: (0, 0)),   # labels of all columns
        ],
        out_specs=pl.BlockSpec((tm, 1), lambda i: (i, 0)),
        compiler_params=pltpu.CompilerParams(
            dimension_semantics=("parallel",),
            vmem_limit_bytes=vmem_limit),
    )(e_n, proxy, lab_col, lab_row)

    return jnp.sum(crit) * jnp.float32(1.0 / n)


def _reference(embed, proxy, label, temperature=0.5, m_p=0.98):
    """Pure-JAX reference mirroring the PyTorch forward."""
    eps = 1e-8
    e_n = embed / jnp.maximum(jnp.linalg.norm(embed, axis=-1, keepdims=True), eps)
    p_n = proxy / jnp.maximum(jnp.linalg.norm(proxy, axis=-1, keepdims=True), eps)
    n = embed.shape[0]
    sim = (e_n @ e_n.T + m_p - 1.0) / temperature
    offdiag = ~jnp.eye(n, dtype=bool)
    sim_max = jnp.max(jnp.where(offdiag, sim, -jnp.inf), axis=1, keepdims=True)
    t = jnp.maximum(sim, 0.0) - sim_max
    removal = (label[:, None] != label[None, :]).astype(jnp.float32)
    row_sum = jnp.sum(removal * jnp.exp(t), axis=1)
    smp2proxy = jnp.sum(e_n * p_n, axis=-1)
    pos_attr = jnp.maximum((m_p - smp2proxy) / temperature, 0.0)
    neg_repul = jnp.log(jnp.exp(-pos_attr) + row_sum)
    return jnp.mean(pos_attr + neg_repul)


if __name__ == "__main__":
    key = jax.random.PRNGKey(0)
    k1, k2, k3, k4, k5, k6 = jax.random.split(key, 6)

    # Primary small test: N=8 samples, D=32 embedding dim.
    N, D, NUM_CLASSES = 8, 32, 10
    embed = jax.random.normal(k1, (N, D), dtype=jnp.float32)
    proxy = jax.random.normal(k2, (N, D), dtype=jnp.float32)
    label = jax.random.randint(k3, (N,), 0, NUM_CLASSES, dtype=jnp.int32)

    loss = data2data_cross_entropy_loss(
        embed, proxy, label, num_classes=NUM_CLASSES, temperature=0.5, m_p=0.98)
    loss = jax.block_until_ready(loss)
    ref = _reference(embed, proxy, label, temperature=0.5, m_p=0.98)
    assert jnp.allclose(loss, ref, rtol=1e-4, atol=1e-5), (loss, ref)

    # Secondary test exercising multi-block grid + row/column padding (N=20,
    # tm forced to 8 -> 3 row blocks, 4 padded rows/cols).
    N2 = 20
    embed2 = jax.random.normal(k4, (N2, D), dtype=jnp.float32)
    proxy2 = jax.random.normal(k5, (N2, D), dtype=jnp.float32)
    label2 = jax.random.randint(k6, (N2,), 0, NUM_CLASSES, dtype=jnp.int32)

    loss2 = data2data_cross_entropy_loss(
        embed2, proxy2, label2, num_classes=NUM_CLASSES,
        temperature=0.5, m_p=0.98, row_block=8)
    loss2 = jax.block_until_ready(loss2)
    ref2 = _reference(embed2, proxy2, label2, temperature=0.5, m_p=0.98)
    assert jnp.allclose(loss2, ref2, rtol=1e-4, atol=1e-5), (loss2, ref2)

    print("KERNEL_OK")
</pallas_src>

<mosaic_0001>
module attributes {stable_mosaic.version = 11 : i64} {
  func.func @_l2norm_kernel(%arg0: i32, %arg1: memref<8x32xf32, #tpu.memory_space<vmem>>, %arg2: memref<8x32xf32, #tpu.memory_space<vmem>>) attributes {dimension_semantics = [#tpu.dimension_semantics<parallel>], iteration_bounds = array<i64: 1>, scalar_prefetch = 0 : i64, scratch_operands = 0 : i64, tpu.core_type = #tpu.core_type<tc>, window_params = [{transform_indices = @transform_0, window_bounds = array<i64: 8, 32>}, {transform_indices = @transform_1, window_bounds = array<i64: 8, 32>}]} {
    %c0 = arith.constant 0 : index
    %c0_0 = arith.constant 0 : index
    %0 = vector.load %arg1[%c0, %c0_0] : memref<8x32xf32, #tpu.memory_space<vmem>>, vector<8x32xf32>
    %1 = arith.mulf %0, %0 : vector<8x32xf32>
    %cst = arith.constant dense<0.000000e+00> : vector<8xf32>
    %2 = vector.multi_reduction <add>, %1, %cst [1] : vector<8x32xf32> to vector<8xf32>
    %3 = vector.shape_cast %2 : vector<8xf32> to vector<8x1xf32>
    %cst_1 = arith.constant 1.000000e-16 : f32
    %4 = vector.broadcast %cst_1 : f32 to vector<8x1xf32>
    %5 = arith.maximumf %3, %4 : vector<8x1xf32>
    %6 = math.rsqrt %5 : vector<8x1xf32>
    %7 = vector.broadcast %6 : vector<8x1xf32> to vector<8x32xf32>
    %8 = arith.mulf %0, %7 : vector<8x32xf32>
    %c0_2 = arith.constant 0 : index
    %c0_3 = arith.constant 0 : index
    %9 = vector.load %arg2[%c0_2, %c0_3] : memref<8x32xf32, #tpu.memory_space<vmem>>, vector<8x32xf32>
    tpu.vector_store %arg2[%c0_2, %c0_3], %8 {strides = array<i32>} : memref<8x32xf32, #tpu.memory_space<vmem>>, vector<8x32xf32>,
    return
  }
  func.func @transform_0(%arg0: i32) -> (i32, i32) {
    %c0_i32 = arith.constant 0 : i32
    %c0_i32_0 = arith.constant 0 : i32
    return %arg0, %c0_i32 : i32, i32
  }
  func.func @transform_1(%arg0: i32) -> (i32, i32) {
    %c0_i32 = arith.constant 0 : i32
    %c0_i32_0 = arith.constant 0 : i32
    return %arg0, %c0_i32 : i32, i32
  }
}

</mosaic_0001>

<bundles_post_ra>
// kernel: tpu_custom_call.1
= control target key start
LH: loop header
LB: loop body
LE: loop exit
PB: predicated region body
PF: predicated region fallthrough
CT: control target
= control target key end

     0   :  { %6 = vsyncpa [#allocation3], 0  ;;  %s112_s0 = inlined_call_operand.hbm [shape: f32[8,32], index: 0, kind: input, shape index: {}]   ;;  %s113_s1 = inlined_call_operand.hbm [shape: f32[8,32], index: 1, kind: output, shape index: {}]  }
   0x1   :  { %7 = vsyncpa [#allocation4], 0  ;;  %s94_s6 = smov [#allocation2]  }
   0x2   :  { %s14_s7 = sshll.u32 %s94_s6, 4  ;;  %s15_s7 = int_to_ptr.vmem [resolvable:$true] %s14_s7 }
   0x3   :  { %s58_s8 = scalar_lea.vmem %s15_s7, 128  ;;  %p63_p1 = scmp.lt.s32.totalorder %s15_s7, %s15_s7 }
   0x4   :  { %p59_p0 = scmp.ne.s32.totalorder %s15_s7, %s58_s8  ;;  %p64_p2 = scmp.lt.s32.totalorder %s58_s8, %s58_s8 }
   0x6   :  { %p65_p3 = por %p64_p2, %p63_p1 }
   0x8   :  { %p66_p4 = pnand %p65_p3, %p59_p0 }
   0xa   :  { %69 = shalt.err (!%p66_p4)
}
   0xb   :  { %17 = dma.hbm_to_vmem [thread:$0]  %s112_s0, 128, %s15_s7, [#allocation3]  }
   0xc   :  { %90 = dma.done.wait [#allocation3], 128  }
   0xd   :  { %91 = vsyncadd [#allocation3], 4294967168  ;;  %v21_v0 = vld [vmem:[#allocation2] sm:$0xff]  ;;  %vm23_vm0 = vcmask 261120   ;;  %s95_s11 = smov [#allocation5]  }
   0xe   :  { %v22_v1 = vmul.f32 %v21_v0, %v21_v0  ;;  %s37_s12 = sshll.u32 %s95_s11, 4  ;;  %s38_s12 = int_to_ptr.vmem [resolvable:$true] %s37_s12 }
   0xf   :  { %s70_s13 = scalar_lea.vmem %s38_s12, 128  ;;  %p75_p6 = scmp.lt.s32.totalorder %s38_s12, %s38_s12 }
  0x10   :  { %v24_v2 = vsel %vm23_vm0, %v22_v1, 0.0  ;;  %p71_p5 = scmp.ne.s32.totalorder %s38_s12, %s70_s13  ;;  %p76_p7 = scmp.lt.s32.totalorder %s70_s13, %s70_s13 }
  0x11   :  { %25 = vadd.xlane.f32.xlu0 %v24_v2 }
  0x12   :  { %p77_p8 = por %p76_p7, %p75_p6 }
  0x14   :  { %p78_p9 = pnand %p77_p8, %p71_p5 }
  0x9a   :  { %v26_v3 = vpop.xlane.xlu0 %25 }
  0x9b   :  { %v27_v4 = vmax.f32 %v26_v3, 1e-16 }
  0x9d   :  { %48 = vrsqrt.f32 %v27_v4 }
  0xaa   :  { %v49_v5 = vpop.eup %48 }
  0xab   :  { %v29_v6 = vmul.f32 %v49_v5, %v21_v0 }
  0xad   :  { %30 = vst.msk [vmem:[#allocation5] sm:$0xff] %vm23_vm0, %v29_v6 }
  0xae   :  { %81 = shalt.err (!%p78_p9)
}
  0xaf   :  { %40 = dma.vmem_to_hbm [thread:$0]  %s38_s12, 128, %s113_s1, [#allocation4]  }
  0xb0   :  { %92 = dma.done.wait [#allocation4], 128  }
  0xb1   :  { %93 = vsyncadd [#allocation4], 4294967168 }
  0xb2   :  { %44 = vsyncpa [#allocation3], 1 }
  0xb3   :  { %45 = vsyncpa [#allocation4], 1 }

</bundles_post_ra>
